<compile_context>
chip_gen: v7x
topology: tpu7x:2x2x1
jax: 0.10.0
libtpu: 0.0.40
codegen_flags: <defaults>
</compile_context>

<pallas_src>
import functools
import math

import jax
import jax.numpy as jnp
from jax import lax
from jax.experimental import pallas as pl
from jax.experimental.pallas import tpu as pltpu

LN_EPS = 1e-5
LEAKY_SLOPE = 0.01  # PyTorch LeakyReLU default negative_slope


# ---------------------------------------------------------------------------
# One-time chip / capability queries (outside the jitted path).
# ---------------------------------------------------------------------------

@functools.lru_cache(maxsize=None)
def _vmem_capacity_bytes():
    try:
        return int(pltpu.get_tpu_info().vmem_capacity_bytes)
    except Exception:
        # Info API unavailable -> assume the smallest budget (v7x per-TC VMEM).
        return 64 << 20


@functools.lru_cache(maxsize=None)
def _is_v5():
    try:
        kind = jax.devices()[0].device_kind.lower()
    except Exception:
        return False
    return "v5" in kind


def _probe_kernel(x_ref, o_ref):
    o_ref[...] = x_ref[...] + 1.0


@functools.lru_cache(maxsize=None)
def _buffered_single_ok():
    """One-time probe: does this build accept pipeline_mode=pl.Buffered(1)?"""
    if not hasattr(pl, "Buffered"):
        return False
    try:
        out = pl.pallas_call(
            _probe_kernel,
            out_shape=jax.ShapeDtypeStruct((8, 128), jnp.float32),
            grid=(1,),
            in_specs=[pl.BlockSpec((8, 128), lambda i: (0, 0),
                                   pipeline_mode=pl.Buffered(1))],
            out_specs=pl.BlockSpec((8, 128), lambda i: (0, 0)),
        )(jnp.zeros((8, 128), jnp.float32))
        jax.block_until_ready(out)
        return True
    except Exception:  # capability probe only; the real kernel never does this
        return False


# ---------------------------------------------------------------------------
# Kernels.
# ---------------------------------------------------------------------------

def _ffn_resident_kernel(x_ref, gamma_ref, beta_ref,
                         w1_ref, b1_ref, w2_ref, b2_ref, o_ref,
                         *, hidden_dtype):
    """One token tile; both (H,H) weights resident in VMEM."""
    # LayerNorm over the hidden dim, f32 statistics.  xf is not kept live past
    # xn (the residual re-reads x_ref below).
    xf = x_ref[...].astype(jnp.float32)
    mean = jnp.mean(xf, axis=-1, keepdims=True)
    cent = xf - mean
    var = jnp.mean(cent * cent, axis=-1, keepdims=True)
    xn = cent * lax.rsqrt(var + LN_EPS) * gamma_ref[...] + beta_ref[...]

    # Linear1 (+bias) + LeakyReLU.  bf16 MXU operands, f32 accumulation.
    h = jnp.dot(xn.astype(w1_ref.dtype), w1_ref[...],
                preferred_element_type=jnp.float32)
    h = h.astype(hidden_dtype) + b1_ref[...]
    h = jnp.maximum(h, h * LEAKY_SLOPE)

    # Linear2 (+bias).
    y = jnp.dot(h.astype(w2_ref.dtype), w2_ref[...],
                preferred_element_type=jnp.float32)
    y = y + b2_ref[...]

    # Residual: re-read x so its f32 upcast has a short live range.
    o_ref[...] = (x_ref[...].astype(jnp.float32) + y).astype(o_ref.dtype)


def _ffn_kblock_kernel(x_ref, gamma_ref, beta_ref,
                       w1_ref, b1_ref, w2_ref, b2_ref, o_ref,
                       xn_ref, acc_ref, *, hidden_dtype):
    """Token tile x FFN-hidden block.  Weight blocks streamed over the k axis."""
    k = pl.program_id(1)

    @pl.when(k == 0)
    def _init():
        xf = x_ref[...].astype(jnp.float32)
        mean = jnp.mean(xf, axis=-1, keepdims=True)
        cent = xf - mean
        var = jnp.mean(cent * cent, axis=-1, keepdims=True)
        xn = cent * lax.rsqrt(var + LN_EPS) * gamma_ref[...] + beta_ref[...]
        xn_ref[...] = xn.astype(xn_ref.dtype)
        acc_ref[...] = jnp.zeros_like(acc_ref)

    h = jnp.dot(xn_ref[...], w1_ref[...], preferred_element_type=jnp.float32)
    h = h.astype(hidden_dtype) + b1_ref[...]
    h = jnp.maximum(h, h * LEAKY_SLOPE)
    acc_ref[...] += jnp.dot(h.astype(w2_ref.dtype), w2_ref[...],
                            preferred_element_type=jnp.float32)

    @pl.when(k == pl.num_programs(1) - 1)
    def _finalize():
        y = acc_ref[...] + b2_ref[...]
        o_ref[...] = (x_ref[...].astype(jnp.float32) + y).astype(o_ref.dtype)


# ---------------------------------------------------------------------------
# pallas_call driver.
# ---------------------------------------------------------------------------

@functools.partial(
    jax.jit,
    static_argnames=("tm", "tk", "use_kblock", "hidden_dtype_name",
                     "single_buffer_params", "vmem_limit"))
def _run(x2d, gamma, beta, w1, b1, w2, b2, *,
         tm, tk, use_kblock, hidden_dtype_name, single_buffer_params,
         vmem_limit):
    M, H = x2d.shape
    hidden_dtype = jnp.dtype(hidden_dtype_name)
    wdtype = w1.dtype
    xdtype = x2d.dtype
    xbytes = jnp.dtype(xdtype).itemsize
    wbytes = jnp.dtype(wdtype).itemsize

    M_pad = ((M + tm - 1) // tm) * tm
    if M_pad != M:
        x2d = jnp.pad(x2d, ((0, M_pad - M), (0, 0)))

    gamma2 = gamma.reshape(1, H).astype(jnp.float32)
    beta2 = beta.reshape(1, H).astype(jnp.float32)
    b1_2 = b1.reshape(1, H).astype(hidden_dtype)
    b2_2 = b2.reshape(1, H).astype(jnp.float32)

    cost = pl.CostEstimate(
        flops=4 * M_pad * H * H,                        # two (M,H)x(H,H) matmuls
        transcendentals=M_pad,                          # rsqrt per token row
        bytes_accessed=(2 * M_pad * H * xbytes          # x in + out
                        + 2 * H * H * wbytes            # weights
                        + 5 * H * 4))                   # small params

    if use_kblock:
        grid = (M_pad // tm, H // tk)
        kern = functools.partial(_ffn_kblock_kernel, hidden_dtype=hidden_dtype)
        row_spec = pl.BlockSpec((tm, H), lambda i, k: (i, 0))
        vec_spec = pl.BlockSpec((1, H), lambda i, k: (0, 0))
        in_specs = [row_spec,
                    vec_spec, vec_spec,                       # gamma, beta
                    pl.BlockSpec((H, tk), lambda i, k: (0, k)),   # w1 column blk
                    pl.BlockSpec((1, tk), lambda i, k: (0, k)),   # b1 blk
                    pl.BlockSpec((tk, H), lambda i, k: (k, 0)),   # w2 row blk
                    vec_spec]                                  # b2
        out_specs = row_spec
        scratch_shapes = [pltpu.VMEM((tm, H), wdtype),         # xn (bf16)
                          pltpu.VMEM((tm, H), jnp.float32)]    # y accumulator
        dim_sem = ("parallel", "arbitrary")
    else:
        grid = (M_pad // tm,)
        kern = functools.partial(_ffn_resident_kernel, hidden_dtype=hidden_dtype)
        row_spec = pl.BlockSpec((tm, H), lambda i: (i, 0))
        if single_buffer_params:
            # Grid-invariant blocks: nothing to prefetch -> single buffer.
            vec_spec = pl.BlockSpec((1, H), lambda i: (0, 0),
                                    pipeline_mode=pl.Buffered(1))
            mat_spec = pl.BlockSpec((H, H), lambda i: (0, 0),
                                    pipeline_mode=pl.Buffered(1))
        else:
            vec_spec = pl.BlockSpec((1, H), lambda i: (0, 0))
            mat_spec = pl.BlockSpec((H, H), lambda i: (0, 0))
        in_specs = [row_spec, vec_spec, vec_spec,
                    mat_spec, vec_spec, mat_spec, vec_spec]
        out_specs = row_spec
        scratch_shapes = []
        dim_sem = ("parallel",)

    out = pl.pallas_call(
        kern,
        out_shape=jax.ShapeDtypeStruct((M_pad, H), xdtype),
        grid_spec=pltpu.PrefetchScalarGridSpec(
            num_scalar_prefetch=0,
            grid=grid,
            in_specs=in_specs,
            out_specs=out_specs,
            scratch_shapes=scratch_shapes),
        cost_estimate=cost,
        compiler_params=pltpu.CompilerParams(
            dimension_semantics=dim_sem,
            vmem_limit_bytes=vmem_limit),
    )(x2d, gamma2, beta2, w1, b1_2, w2, b2_2)

    if M_pad != M:
        out = out[:M]
    return out


# ---------------------------------------------------------------------------
# Public wrapper: planning (tile sizes, path choice, VMEM limit) happens here.
# ---------------------------------------------------------------------------

def residual_feed_forward(x, gamma, beta, w1, b1, w2, b2, *,
                          matmul_dtype=jnp.bfloat16, force_kblock=False):
    """x: (B, S, H).  w1/w2: (H, H) stored (in, out) = PyTorch W.T.
    gamma/beta/b1/b2: (H,).  Pass w1/w2 already cast to `matmul_dtype`
    (cast once at parameter-load time); jnp.asarray below is then a no-op."""
    B, S, H = x.shape
    M = B * S
    x2d = x.reshape(M, H)

    w1c = jnp.asarray(w1, matmul_dtype)
    w2c = jnp.asarray(w2, matmul_dtype)

    xbytes = jnp.dtype(x.dtype).itemsize
    wbytes = jnp.dtype(matmul_dtype).itemsize

    vmem_cap = _vmem_capacity_bytes()
    budget = max(32 << 20, vmem_cap - (16 << 20))

    # Per token-row VMEM cost: x/out tiles (double-buffered) + f32 temps.
    per_row = 2 * 2 * H * xbytes + 6 * H * 4
    resident_db = 2 * H * H * wbytes * 2       # weights, double-buffered
    resident_sb = 2 * H * H * wbytes           # weights, single-buffered

    # Path choice: resident weights on big-VMEM chips (v5e/v6e), k-blocked
    # weight streaming when residency would blow the (v7x) budget.
    if force_kblock:
        use_kblock, single_buffer = True, False
    elif resident_db + 128 * per_row <= budget:
        use_kblock, single_buffer = False, _buffered_single_ok()
    elif resident_sb + 128 * per_row <= budget and _buffered_single_ok():
        use_kblock, single_buffer = False, True
    else:
        use_kblock, single_buffer = True, False

    if use_kblock:
        tk = H
        for cand in (1024, 512, 256, 128):     # multiples of 256 preferred (MXU)
            if H % cand == 0:
                tk = cand
                break
        weight_resident = 2 * 2 * H * tk * wbytes   # double-buffered blocks
        per_row += (wbytes + 4) * H                 # xn + f32 accumulator scratch
    else:
        tk = 0
        weight_resident = resident_sb if single_buffer else resident_db

    # Token tile: adaptive to H, shrunk until it fits the VMEM budget,
    # clamped to the token count and kept a multiple of 8 sublanes.
    if H <= 1024:
        tm = 1024
    elif H <= 2048:
        tm = 512
    else:
        tm = 256
    while tm > 8 and weight_resident + tm * per_row > budget:
        tm //= 2
    tm = min(tm, ((M + 7) // 8) * 8)
    tm = max(8, (tm // 8) * 8)

    vmem_est = weight_resident + tm * per_row + (4 << 20)
    vmem_limit = int(max(32 << 20, min(int(vmem_est * 1.25) + (8 << 20), budget)))

    # bf16 VPU exists on v6e/v7x; keep the hidden activation f32 on v5e.
    hidden_dtype = jnp.float32 if _is_v5() else jnp.dtype(matmul_dtype)

    out = _run(x2d, gamma, beta, w1c, b1, w2c, b2,
               tm=int(tm), tk=int(tk), use_kblock=bool(use_kblock),
               hidden_dtype_name=jnp.dtype(hidden_dtype).name,
               single_buffer_params=bool(single_buffer),
               vmem_limit=vmem_limit)
    return out.reshape(B, S, H)


# ---------------------------------------------------------------------------
# Reference + self-test.
# ---------------------------------------------------------------------------

def _reference(x, gamma, beta, w1, b1, w2, b2,
               matmul_dtype=None, hidden_dtype=jnp.float32):
    xf = x.astype(jnp.float32)
    mean = jnp.mean(xf, axis=-1, keepdims=True)
    var = jnp.mean((xf - mean) ** 2, axis=-1, keepdims=True)
    xn = (xf - mean) * lax.rsqrt(var + LN_EPS) * gamma + beta
    w1f = w1.astype(jnp.float32)
    w2f = w2.astype(jnp.float32)
    if matmul_dtype is None:
        h = xn @ w1f + b1
        h = jnp.maximum(h, LEAKY_SLOPE * h)
        y = h @ w2f + b2
    else:
        md = matmul_dtype
        h = jnp.dot(xn.astype(md), w1.astype(md),
                    preferred_element_type=jnp.float32)
        h = h.astype(hidden_dtype) + b1.astype(hidden_dtype)
        h = jnp.maximum(h, LEAKY_SLOPE * h).astype(jnp.float32)
        y = jnp.dot(h.astype(md), w2.astype(md),
                    preferred_element_type=jnp.float32) + b2
    return (xf + y).astype(x.dtype)


if __name__ == "__main__":
    B, S, H = 2, 8, 32  # batch, seq, hidden
    key = jax.random.PRNGKey(0)
    kx, k1, k2, k3, k4 = jax.random.split(key, 5)

    x = jax.random.normal(kx, (B, S, H), dtype=jnp.float32)

    bound = 1.0 / math.sqrt(H)
    # Stored as (in, out) = W.T relative to PyTorch's (out, in) convention.
    w1 = jax.random.uniform(k1, (H, H), jnp.float32, -bound, bound)
    b1 = jax.random.uniform(k2, (H,), jnp.float32, -bound, bound)
    w2 = jax.random.uniform(k3, (H, H), jnp.float32, -bound, bound)
    b2 = jax.random.uniform(k4, (H,), jnp.float32, -bound, bound)
    gamma = jnp.ones((H,), jnp.float32)   # LayerNorm weight init
    beta = jnp.zeros((H,), jnp.float32)   # LayerNorm bias init

    # Cast weights to the MXU dtype ONCE at parameter-load time (no per-call
    # f32->bf16 HBM round trip inside the kernel wrapper).
    w1_bf = w1.astype(jnp.bfloat16)
    w2_bf = w2.astype(jnp.bfloat16)

    # Default path (resident weights on this tiny problem).
    out = residual_feed_forward(x, gamma, beta, w1_bf, b1, w2_bf, b2)
    out = jax.block_until_ready(out)
    assert out.shape == (B, S, H)

    # Also exercise the k-blocked (v7x / large-H) path on the same problem.
    out_kb = residual_feed_forward(x, gamma, beta, w1_bf, b1, w2_bf, b2,
                                   force_kblock=True)
    out_kb = jax.block_until_ready(out_kb)

    hidden_dtype = jnp.float32 if _is_v5() else jnp.bfloat16
    ref_matched = _reference(x, gamma, beta, w1_bf, b1, w2_bf, b2,
                             matmul_dtype=jnp.bfloat16,
                             hidden_dtype=hidden_dtype)
    ref_f32 = _reference(x, gamma, beta, w1, b1, w2, b2)

    # Against a reference using the same bf16 matmul / hidden precision...
    assert jnp.allclose(out, ref_matched, atol=2e-2, rtol=2e-2), (
        float(jnp.max(jnp.abs(out - ref_matched))))
    assert jnp.allclose(out_kb, ref_matched, atol=2e-2, rtol=2e-2), (
        float(jnp.max(jnp.abs(out_kb - ref_matched))))
    # ...and loosely against the pure-f32 forward for semantic sanity.
    assert jnp.allclose(out, ref_f32, atol=1e-1, rtol=1e-1), (
        float(jnp.max(jnp.abs(out - ref_f32))))
    assert jnp.allclose(out_kb, ref_f32, atol=1e-1, rtol=1e-1), (
        float(jnp.max(jnp.abs(out_kb - ref_f32))))

    print("KERNEL_OK")
</pallas_src>

<mosaic_0001>
module attributes {stable_mosaic.version = 11 : i64} {
  func.func @_probe_kernel(%arg0: i32, %arg1: memref<8x128xf32, #tpu.memory_space<vmem>>, %arg2: memref<8x128xf32, #tpu.memory_space<vmem>>) attributes {dimension_semantics = [#tpu.dimension_semantics<arbitrary>], iteration_bounds = array<i64: 1>, scalar_prefetch = 0 : i64, scratch_operands = 0 : i64, tpu.core_type = #tpu.core_type<tc>, window_params = [{pipeline_mode = #tpu.pipeline_mode<synchronous>, transform_indices = @transform_0, window_bounds = array<i64: 8, 128>}, {pipeline_mode = #tpu.pipeline_mode<synchronous>, transform_indices = @transform_1, window_bounds = array<i64: 8, 128>}]} {
    %c0 = arith.constant 0 : index
    %c0_0 = arith.constant 0 : index
    %0 = vector.load %arg1[%c0, %c0_0] : memref<8x128xf32, #tpu.memory_space<vmem>>, vector<8x128xf32>
    %cst = arith.constant 1.000000e+00 : f32
    %1 = vector.broadcast %cst : f32 to vector<8x128xf32>
    %2 = arith.addf %0, %1 : vector<8x128xf32>
    %c0_1 = arith.constant 0 : index
    %c0_2 = arith.constant 0 : index
    %3 = vector.load %arg2[%c0_1, %c0_2] : memref<8x128xf32, #tpu.memory_space<vmem>>, vector<8x128xf32>
    tpu.vector_store %arg2[%c0_1, %c0_2], %2 {strides = array<i32>} : memref<8x128xf32, #tpu.memory_space<vmem>>, vector<8x128xf32>,
    return
  }
  func.func @transform_0(%arg0: i32) -> (i32, i32) {
    %c0_i32 = arith.constant 0 : i32
    %c0_i32_0 = arith.constant 0 : i32
    %c0_i32_1 = arith.constant 0 : i32
    return %c0_i32, %c0_i32_0 : i32, i32
  }
  func.func @transform_1(%arg0: i32) -> (i32, i32) {
    %c0_i32 = arith.constant 0 : i32
    %c0_i32_0 = arith.constant 0 : i32
    %c0_i32_1 = arith.constant 0 : i32
    return %c0_i32, %c0_i32_0 : i32, i32
  }
}

module attributes {stable_mosaic.version = 11 : i64} {
  func.func @_ffn_resident_kernel(%arg0: i32, %arg1: memref<16x32xf32, #tpu.memory_space<vmem>>, %arg2: memref<1x32xf32, #tpu.memory_space<vmem>>, %arg3: memref<1x32xf32, #tpu.memory_space<vmem>>, %arg4: memref<32x32xbf16, #tpu.memory_space<vmem>>, %arg5: memref<1x32xbf16, #tpu.memory_space<vmem>>, %arg6: memref<32x32xbf16, #tpu.memory_space<vmem>>, %arg7: memref<1x32xf32, #tpu.memory_space<vmem>>, %arg8: memref<16x32xf32, #tpu.memory_space<vmem>>) attributes {dimension_semantics = [#tpu.dimension_semantics<parallel>], iteration_bounds = array<i64: 1>, scalar_prefetch = 0 : i64, scratch_operands = 0 : i64, tpu.core_type = #tpu.core_type<tc>, window_params = [{transform_indices = @transform_0, window_bounds = array<i64: 16, 32>}, {pipeline_mode = #tpu.pipeline_mode<synchronous>, transform_indices = @transform_1, window_bounds = array<i64: 1, 32>}, {pipeline_mode = #tpu.pipeline_mode<synchronous>, transform_indices = @transform_2, window_bounds = array<i64: 1, 32>}, {pipeline_mode = #tpu.pipeline_mode<synchronous>, transform_indices = @transform_3, window_bounds = array<i64: 32, 32>}, {pipeline_mode = #tpu.pipeline_mode<synchronous>, transform_indices = @transform_4, window_bounds = array<i64: 1, 32>}, {pipeline_mode = #tpu.pipeline_mode<synchronous>, transform_indices = @transform_5, window_bounds = array<i64: 32, 32>}, {pipeline_mode = #tpu.pipeline_mode<synchronous>, transform_indices = @transform_6, window_bounds = array<i64: 1, 32>}, {transform_indices = @transform_7, window_bounds = array<i64: 16, 32>}]} {
    %c0 = arith.constant 0 : index
    %c0_0 = arith.constant 0 : index
    %0 = vector.load %arg1[%c0, %c0_0] : memref<16x32xf32, #tpu.memory_space<vmem>>, vector<16x32xf32>
    %cst = arith.constant dense<0.000000e+00> : vector<16xf32>
    %1 = vector.multi_reduction <add>, %0, %cst [1] : vector<16x32xf32> to vector<16xf32>
    %2 = vector.shape_cast %1 : vector<16xf32> to vector<16x1xf32>
    %cst_1 = arith.constant 3.200000e+01 : f32
    %3 = vector.broadcast %cst_1 : f32 to vector<16x1xf32>
    %4 = arith.divf %2, %3 : vector<16x1xf32>
    %5 = vector.broadcast %4 : vector<16x1xf32> to vector<16x32xf32>
    %6 = arith.subf %0, %5 : vector<16x32xf32>
    %7 = arith.mulf %6, %6 : vector<16x32xf32>
    %cst_2 = arith.constant dense<0.000000e+00> : vector<16xf32>
    %8 = vector.multi_reduction <add>, %7, %cst_2 [1] : vector<16x32xf32> to vector<16xf32>
    %9 = vector.shape_cast %8 : vector<16xf32> to vector<16x1xf32>
    %cst_3 = arith.constant 3.200000e+01 : f32
    %10 = vector.broadcast %cst_3 : f32 to vector<16x1xf32>
    %11 = arith.divf %9, %10 : vector<16x1xf32>
    %cst_4 = arith.constant 9.99999974E-6 : f32
    %12 = vector.broadcast %cst_4 : f32 to vector<16x1xf32>
    %13 = arith.addf %11, %12 : vector<16x1xf32>
    %14 = math.rsqrt %13 : vector<16x1xf32>
    %15 = vector.broadcast %14 : vector<16x1xf32> to vector<16x32xf32>
    %16 = arith.mulf %6, %15 : vector<16x32xf32>
    %c0_5 = arith.constant 0 : index
    %c0_6 = arith.constant 0 : index
    %17 = vector.load %arg2[%c0_5, %c0_6] : memref<1x32xf32, #tpu.memory_space<vmem>>, vector<1x32xf32>
    %18 = vector.broadcast %17 : vector<1x32xf32> to vector<16x32xf32>
    %19 = arith.mulf %16, %18 : vector<16x32xf32>
    %c0_7 = arith.constant 0 : index
    %c0_8 = arith.constant 0 : index
    %20 = vector.load %arg3[%c0_7, %c0_8] : memref<1x32xf32, #tpu.memory_space<vmem>>, vector<1x32xf32>
    %21 = vector.broadcast %20 : vector<1x32xf32> to vector<16x32xf32>
    %22 = arith.addf %19, %21 : vector<16x32xf32>
    %23 = arith.truncf %22 : vector<16x32xf32> to vector<16x32xbf16>
    %c0_9 = arith.constant 0 : index
    %c0_10 = arith.constant 0 : index
    %24 = vector.load %arg4[%c0_9, %c0_10] : memref<32x32xbf16, #tpu.memory_space<vmem>>, vector<32x32xbf16>
    %cst_11 = arith.constant dense<0.000000e+00> : vector<16x32xf32>
    %25 = tpu.matmul %23, %24, %cst_11 {dimension_numbers = #tpu.dot_dimension_numbers<[1], [0], [0], [1], [0, 0, 1, 1], [], []>} : vector<16x32xbf16>, vector<32x32xbf16>, vector<16x32xf32> -> vector<16x32xf32>
    %26 = arith.truncf %25 : vector<16x32xf32> to vector<16x32xbf16>
    %c0_12 = arith.constant 0 : index
    %c0_13 = arith.constant 0 : index
    %27 = vector.load %arg5[%c0_12, %c0_13] : memref<1x32xbf16, #tpu.memory_space<vmem>>, vector<1x32xbf16>
    %28 = vector.broadcast %27 : vector<1x32xbf16> to vector<16x32xbf16>
    %29 = arith.addf %26, %28 : vector<16x32xbf16>
    %cst_14 = arith.constant 1.000980e-02 : bf16
    %30 = vector.broadcast %cst_14 : bf16 to vector<16x32xbf16>
    %31 = arith.mulf %29, %30 : vector<16x32xbf16>
    %32 = arith.maximumf %29, %31 : vector<16x32xbf16>
    %c0_15 = arith.constant 0 : index
    %c0_16 = arith.constant 0 : index
    %33 = vector.load %arg6[%c0_15, %c0_16] : memref<32x32xbf16, #tpu.memory_space<vmem>>, vector<32x32xbf16>
    %cst_17 = arith.constant dense<0.000000e+00> : vector<16x32xf32>
    %34 = tpu.matmul %32, %33, %cst_17 {dimension_numbers = #tpu.dot_dimension_numbers<[1], [0], [0], [1], [0, 0, 1, 1], [], []>} : vector<16x32xbf16>, vector<32x32xbf16>, vector<16x32xf32> -> vector<16x32xf32>
    %c0_18 = arith.constant 0 : index
    %c0_19 = arith.constant 0 : index
    %35 = vector.load %arg7[%c0_18, %c0_19] : memref<1x32xf32, #tpu.memory_space<vmem>>, vector<1x32xf32>
    %36 = vector.broadcast %35 : vector<1x32xf32> to vector<16x32xf32>
    %37 = arith.addf %34, %36 : vector<16x32xf32>
    %c0_20 = arith.constant 0 : index
    %c0_21 = arith.constant 0 : index
    %38 = vector.load %arg1[%c0_20, %c0_21] : memref<16x32xf32, #tpu.memory_space<vmem>>, vector<16x32xf32>
    %39 = arith.addf %38, %37 : vector<16x32xf32>
    %c0_22 = arith.constant 0 : index
    %c0_23 = arith.constant 0 : index
    %40 = vector.load %arg8[%c0_22, %c0_23] : memref<16x32xf32, #tpu.memory_space<vmem>>, vector<16x32xf32>
    tpu.vector_store %arg8[%c0_22, %c0_23], %39 {strides = array<i32>} : memref<16x32xf32, #tpu.memory_space<vmem>>, vector<16x32xf32>,
    return
  }
  func.func @transform_0(%arg0: i32) -> (i32, i32) {
    %c0_i32 = arith.constant 0 : i32
    %c0_i32_0 = arith.constant 0 : i32
    return %arg0, %c0_i32 : i32, i32
  }
  func.func @transform_1(%arg0: i32) -> (i32, i32) {
    %c0_i32 = arith.constant 0 : i32
    %c0_i32_0 = arith.constant 0 : i32
    %c0_i32_1 = arith.constant 0 : i32
    return %c0_i32, %c0_i32_0 : i32, i32
  }
  func.func @transform_2(%arg0: i32) -> (i32, i32) {
    %c0_i32 = arith.constant 0 : i32
    %c0_i32_0 = arith.constant 0 : i32
    %c0_i32_1 = arith.constant 0 : i32
    return %c0_i32, %c0_i32_0 : i32, i32
  }
  func.func @transform_3(%arg0: i32) -> (i32, i32) {
    %c0_i32 = arith.constant 0 : i32
    %c0_i32_0 = arith.constant 0 : i32
    %c0_i32_1 = arith.constant 0 : i32
    return %c0_i32, %c0_i32_0 : i32, i32
  }
  func.func @transform_4(%arg0: i32) -> (i32, i32) {
    %c0_i32 = arith.constant 0 : i32
    %c0_i32_0 = arith.constant 0 : i32
    %c0_i32_1 = arith.constant 0 : i32
    return %c0_i32, %c0_i32_0 : i32, i32
  }
  func.func @transform_5(%arg0: i32) -> (i32, i32) {
    %c0_i32 = arith.constant 0 : i32
    %c0_i32_0 = arith.constant 0 : i32
    %c0_i32_1 = arith.constant 0 : i32
    return %c0_i32, %c0_i32_0 : i32, i32
  }
  func.func @transform_6(%arg0: i32) -> (i32, i32) {
    %c0_i32 = arith.constant 0 : i32
    %c0_i32_0 = arith.constant 0 : i32
    %c0_i32_1 = arith.constant 0 : i32
    return %c0_i32, %c0_i32_0 : i32, i32
  }
  func.func @transform_7(%arg0: i32) -> (i32, i32) {
    %c0_i32 = arith.constant 0 : i32
    %c0_i32_0 = arith.constant 0 : i32
    return %arg0, %c0_i32 : i32, i32
  }
}

</mosaic_0001>

<bundles_post_ra>
// kernel: tpu_custom_call.1
= control target key start
LH: loop header
LB: loop body
LE: loop exit
PB: predicated region body
PF: predicated region fallthrough
CT: control target
= control target key end

     0   :  { %6 = vsyncpa [#allocation3], 0  ;;  %s125_s0 = inlined_call_operand.hbm [shape: f32[8,128], index: 0, kind: input, shape index: {}]   ;;  %s126_s1 = inlined_call_operand.hbm [shape: f32[8,128], index: 1, kind: output, shape index: {}]  }
   0x1   :  { %7 = vsyncpa [#allocation4], 0  ;;  %s89_s6 = smov [#allocation2]   ;;  %s41_s10 = scalar_lea.hbm %s125_s0, 128 }
   0x2   :  { %s14_s7 = sshll.u32 %s89_s6, 4  ;;  %p42_p0 = scmp.ne.s32.totalorder %s125_s0, %s41_s10  ;;  %s15_s7 = int_to_ptr.vmem [resolvable:$true] %s14_s7 }
   0x3   :  { %p45_p1 = scmp.lt.u32.totalorder %s41_s10, %s125_s0 }
   0x5   :  { %p47_p2 = pnand %p45_p1, %p42_p0 }
   0x7   :  { %50 = shalt.err (!%p47_p2)
}
   0x8   :  { %s51_s15 = scalar_lea.vmem %s15_s7, 128  ;;  %p56_p4 = scmp.lt.s32.totalorder %s15_s7, %s15_s7 }
   0x9   :  { %p52_p3 = scmp.ne.s32.totalorder %s15_s7, %s51_s15  ;;  %p57_p5 = scmp.lt.s32.totalorder %s51_s15, %s51_s15 }
   0xb   :  { %p58_p6 = por %p57_p5, %p56_p4 }
   0xd   :  { %p59_p7 = pnand %p58_p6, %p52_p3 }
   0xf   :  { %62 = shalt.err (!%p59_p7)
}
  0x10   :  { %17 = dma.hbm_to_vmem [thread:$0]  %s125_s0, 128, %s15_s7, [#allocation3]  }
  0x11   :  { %85 = dma.done.wait [#allocation3], 128  }
  0x12   :  { %86 = vsyncadd [#allocation3], 4294967168  ;;  %s90_s18 = smov [#allocation5]   ;;  %v21_v0 = vld [vmem:[#allocation2] sm:$0xff] }
  0x13   :  { %s30_s19 = sshll.u32 %s90_s18, 4  ;;  %v22_v1 = vadd.f32 1.0, %v21_v0  ;;  %s31_s19 = int_to_ptr.vmem [resolvable:$true] %s30_s19 }
  0x14   :  { %s63_s20 = scalar_lea.vmem %s31_s19, 128  ;;  %p68_p9 = scmp.lt.s32.totalorder %s31_s19, %s31_s19 }
  0x15   :  { %23 = vst [vmem:[#allocation5] sm:$0xff] %v22_v1  ;;  %p64_p8 = scmp.ne.s32.totalorder %s31_s19, %s63_s20  ;;  %p69_p10 = scmp.lt.s32.totalorder %s63_s20, %s63_s20 }
  0x17   :  { %p70_p11 = por %p69_p10, %p68_p9 }
  0x19   :  { %p71_p12 = pnand %p70_p11, %p64_p8 }
  0x1b   :  { %74 = shalt.err (!%p71_p12)
}
  0x1c   :  { %s75_s23 = scalar_lea.hbm %s126_s1, 128 }
  0x1d   :  { %p76_p13 = scmp.ne.s32.totalorder %s126_s1, %s75_s23  ;;  %p79_p0 = scmp.lt.u32.totalorder %s75_s23, %s126_s1 }
  0x1f   :  { %p81_p1 = pnand %p79_p0, %p76_p13 }
  0x21   :  { %84 = shalt.err (!%p81_p1)
}
  0x22   :  { %33 = dma.vmem_to_hbm [thread:$0]  %s31_s19, 128, %s126_s1, [#allocation4]  }
  0x23   :  { %87 = dma.done.wait [#allocation4], 128  }
  0x24   :  { %88 = vsyncadd [#allocation4], 4294967168 }
  0x25   :  { %37 = vsyncpa [#allocation3], 1 }
  0x26   :  { %38 = vsyncpa [#allocation4], 1 }

// kernel: _run.1
= control target key start
LH: loop header
LB: loop body
LE: loop exit
PB: predicated region body
PF: predicated region fallthrough
CT: control target
= control target key end

     0   :  { %12 = vsyncpa [#allocation3], 0  ;;  %s463_s0 = inlined_call_operand.hbm [shape: f32[16,32], index: 0, kind: input, shape index: {}]   ;;  %s464_s1 = inlined_call_operand.vmem [shape: f32[1,32], index: 1, kind: input, shape index: {}]   ;;  %s465_s2 = inlined_call_operand.vmem [shape: f32[1,32], index: 2, kind: input, shape index: {}]   ;;  %s466_s3 = inlined_call_operand.vmem [shape: bf16[32,32], index: 3, kind: input, shape index: {}]   ;;  %s467_s4 = inlined_call_operand.vmem [shape: bf16[1,32], index: 4, kind: input, shape index: {}]   ;;  %s468_s5 = inlined_call_operand.vmem [shape: bf16[32,32], index: 5, kind: input, shape index: {}]   ;;  %s469_s6 = inlined_call_operand.vmem [shape: f32[1,32], index: 6, kind: input, shape index: {}]   ;;  %s470_s7 = inlined_call_operand.hbm [shape: f32[16,32], index: 7, kind: output, shape index: {}]  }
   0x1   :  { %13 = vsyncpa [#allocation4], 0  ;;  %s345_s24 = smov [#allocation2]   ;;  %s297_s28 = scalar_lea.hbm %s463_s0, 256 }
   0x2   :  { %s19_s25 = sshll.u32 %s345_s24, 4  ;;  %p298_p0 = scmp.ne.s32.totalorder %s463_s0, %s297_s28  ;;  %s20_s25 = int_to_ptr.vmem [resolvable:$true] %s19_s25 }
   0x3   :  { %p301_p1 = scmp.lt.u32.totalorder %s297_s28, %s463_s0 }
   0x5   :  { %p303_p2 = pnand %p301_p1, %p298_p0 }
   0x7   :  { %306 = shalt.err (!%p303_p2)
}
   0x8   :  { %s307_s10 = scalar_lea.vmem %s20_s25, 256  ;;  %p312_p4 = scmp.lt.s32.totalorder %s20_s25, %s20_s25 }
   0x9   :  { %p308_p3 = scmp.ne.s32.totalorder %s20_s25, %s307_s10  ;;  %p313_p5 = scmp.lt.s32.totalorder %s307_s10, %s307_s10 }
   0xb   :  { %p314_p6 = por %p313_p5, %p312_p4 }
   0xd   :  { %p315_p7 = pnand %p314_p6, %p308_p3 }
   0xf   :  { %318 = shalt.err (!%p315_p7)
}
  0x10   :  { %s346_s11 = smov 128   ;;  %s347_s12 = smov 8  }
  0x11   :  { %25 = dma.hbm_to_vmem [thread:$0]  %s463_s0, 256, %s20_s25, [#allocation3], %s346_s11, %s346_s11, %s347_s12  }
  0x12   :  { %341 = dma.done.wait [#allocation3], 256  }
  0x13   :  { %342 = vsyncadd [#allocation3], 4294967040  ;;  %vm45_vm0 = vcmask 261120   ;;  %v406_v0 = vld [vmem:[#allocation2] sm:$0xff]  ;;  %v408_v1 = vld [vmem:[#allocation2 + $0x8] sm:$0xff]  ;;  %v348_v15 = vmov 0.0   ;;  %v157_v36 = vlaneseq }
  0x14   :  { %v46_v2 = vsel %vm45_vm0, %v406_v0, 0.0  ;;  %v49_v3 = vsel %vm45_vm0, %v408_v1, 0.0  ;;  %v289_v14 = vld [vmem:[%s466_s3] sm:$0xff]   ;;  %267 = vmatprep.subr.bf16.mxu0 %v348_v15  ;;  %275 = vmatprep.subr.bf16.mxu1 %v348_v15  ;;  %v290_v16 = vld [vmem:[%s466_s3 + $0x8] sm:$0xff]   ;;  %vm349_vm1 = vmmov 0  }
  0x15   :  { %47 = vadd.xlane.f32.xlu0 %v46_v2  ;;  %268 = vmatpush3.bf16.msra.mxu0 %v289_v14  ;;  %v252_v25 = vld [vmem:[%s464_s1] ss:$0 sm:$0xff]  ;;  %v292_v35 = vld [vmem:[%s468_s5 + $0x8] sm:$0xff]   ;;  %v158_v37 = vshrl.u32 %v157_v36, 7 }
  0x16   :  { %271 = vmatprep.mubr.msk.bf16.mxu0 %vm349_vm1, %v348_v15  ;;  %269 = vmatprep.subr.bf16.mxu0 %v348_v15  ;;  %v253_v29 = vld [vmem:[%s465_s2] ss:$0 sm:$0xff] }
  0x17   :  { %279 = vmatprep.mubr.msk.bf16.mxu1 %vm349_vm1, %v348_v15  ;;  %v291_v34 = vld [vmem:[%s468_s5] sm:$0xff]   ;;  %v159_v40 = vsub.s32 0, %v158_v37 }
  0x18   :  { %276 = vmatpush3.bf16.msra.mxu1 %v291_v34  ;;  %v153_v38 = vld [vmem:[%s467_s4] sm:$0x1]  ;;  %s350_s4 = smov [#allocation5]  }
  0x19   :  { %50 = vadd.xlane.f32.xlu0 %v49_v3  ;;  %270 = vmatpush3.bf16.msra.mxu0 %v290_v16  ;;  %v155_v39 = vpack.i.b16 %v153_v38, %v153_v38  ;;  %v257_v50 = vld [vmem:[%s469_s6] ss:$0 sm:$0xff]  ;;  %s240_s26 = sshll.u32 %s350_s4, 4  ;;  %s241_s26 = int_to_ptr.vmem [resolvable:$true] %s240_s26 }
  0x1a   :  { %277 = vmatprep.subr.bf16.mxu1 %v348_v15  ;;  %s319_s27 = scalar_lea.vmem %s241_s26, 256  ;;  %p324_p9 = scmp.lt.s32.totalorder %s241_s26, %s241_s26 }
  0x1b   :  { %v160_v43 = vrot.slane %v155_v39, %v159_v40  ;;  %p320_p8 = scmp.ne.s32.totalorder %s241_s26, %s319_s27  ;;  %p325_p10 = scmp.lt.s32.totalorder %s319_s27, %s319_s27 }
  0x1c   :  { %278 = vmatpush3.bf16.msra.mxu1 %v292_v35 }
  0x1d   :  { %p326_p11 = por %p325_p10, %p324_p9 }
  0x1f   :  { %p327_p12 = pnand %p326_p11, %p320_p8 }
  0xa2   :  { %v48_v4 = vpop.xlane.xlu0 %47 }
  0xa3   :  { %v53_v5 = vmul.f32 0.03125, %v48_v4 }
  0xa5   :  { %v55_v6 = vsub.f32 %v406_v0, %v53_v5 }
  0xa6   :  { %v51_v7 = vpop.xlane.xlu0 %50 }
  0xa7   :  { %v54_v8 = vmul.f32 0.03125, %v51_v7  ;;  %v57_v9 = vmul.f32 %v55_v6, %v55_v6 }
  0xa9   :  { %v56_v10 = vsub.f32 %v408_v1, %v54_v8  ;;  %v59_v11 = vsel %vm45_vm0, %v57_v9, 0.0 }
  0xaa   :  { %60 = vadd.xlane.f32.xlu1 %v59_v11 }
  0xab   :  { %v58_v12 = vmul.f32 %v56_v10, %v56_v10 }
  0xad   :  { %v62_v13 = vsel %vm45_vm0, %v58_v12, 0.0 }
  0xae   :  { %63 = vadd.xlane.f32.xlu1 %v62_v13 }
 0x137   :  { %v61_v17 = vpop.xlane.xlu1 %60 }
 0x138   :  { %v65_v18 = vmul.f32 0.03125, %v61_v17 }
 0x13a   :  { %v67_v19 = vadd.f32 1e-05, %v65_v18 }
 0x13b   :  { %v64_v20 = vpop.xlane.xlu1 %63 }
 0x13c   :  { %293 = vrsqrt.f32 %v67_v19  ;;  %v66_v21 = vmul.f32 0.03125, %v64_v20 }
 0x13e   :  { %v68_v22 = vadd.f32 1e-05, %v66_v21 }
 0x140   :  { %295 = vrsqrt.f32 %v68_v22 }
 0x146   :  { %v294_v23 = vpop.eup %293 }
 0x147   :  { %v71_v24 = vmul.f32 %v294_v23, %v55_v6 }
 0x149   :  { %v80_v28 = vmul.f32 %v252_v25, %v71_v24 }
 0x14a   :  { %v296_v26 = vpop.eup %295 }
 0x14b   :  { %v72_v27 = vmul.f32 %v296_v26, %v56_v10  ;;  %v89_v31 = vadd.f32 %v253_v29, %v80_v28 }
 0x14d   :  { %v81_v30 = vmul.f32 %v252_v25, %v72_v27 }
 0x14f   :  { %v90_v32 = vadd.f32 %v253_v29, %v81_v30 }
 0x151   :  { %v91_v33 = vpack.c.bf16 %v90_v32, %v89_v31 }
 0x153   :  { %272 = vmatmul.mubr.msk.bf16.vlgmr.msra.gmra.mrb[0].mxu0 %vm45_vm0, %v91_v33 }
 0x226   :  { %v145_v41 = vpop.f32.mrb[0].mxu0 }
 0x227   :  { %v273_v42 = vpop.f32.mrb[1].mxu0 }
 0x228   :  { %v148_v44 = vpop.f32.mrb[2].mxu0 }
 0x229   :  { %v152_v45 = vpack.c.bf16 %v148_v44, %v145_v41  ;;  %v274_v46 = vpop.f32.mrb[3].mxu0 }
 0x22b   :  { %v161_v47 = vadd.bf16 %v160_v43, %v152_v45 }
 0x22d   :  { %v162_v48 = vmul.bf16 1009007652, %v161_v47 }
 0x22f   :  { %v163_v49 = vmax.bf16 %v162_v48, %v161_v47 }
 0x231   :  { %280 = vmatmul.mubr.msk.bf16.vlgmr.msra.gmra.mrb[0].mxu1 %vm45_vm0, %v163_v49 }
 0x304   :  { %v224_v51 = vpop.f32.mrb[0].mxu1 }
 0x305   :  { %v225_v52 = vadd.f32 %v257_v50, %v224_v51  ;;  %v281_v53 = vpop.f32.mrb[1].mxu1 }
 0x306   :  { %v227_v54 = vpop.f32.mrb[2].mxu1 }
 0x307   :  { %v231_v55 = vadd.f32 %v225_v52, %v406_v0  ;;  %v228_v56 = vadd.f32 %v257_v50, %v227_v54  ;;  %v282_v57 = vpop.f32.mrb[3].mxu1 }
 0x309   :  { %233 = vst.msk [vmem:[#allocation5] sm:$0xff] %vm45_vm0, %v231_v55  ;;  %v232_v58 = vadd.f32 %v228_v56, %v408_v1 }
 0x30b   :  { %234 = vst.msk [vmem:[#allocation5 + $0x8] sm:$0xff] %vm45_vm0, %v232_v58 }
 0x30c   :  { %330 = shalt.err (!%p327_p12)
}
 0x30d   :  { %s331_s29 = scalar_lea.hbm %s470_s7, 256 }
 0x30e   :  { %p332_p13 = scmp.ne.s32.totalorder %s470_s7, %s331_s29  ;;  %p335_p0 = scmp.lt.u32.totalorder %s331_s29, %s470_s7 }
 0x310   :  { %p337_p1 = pnand %p335_p0, %p332_p13 }
 0x312   :  { %340 = shalt.err (!%p337_p1)
}
 0x313   :  { %246 = dma.vmem_to_hbm [thread:$0]  %s241_s26, 256, %s470_s7, [#allocation4], %s346_s11, %s346_s11, %s347_s12  }
 0x314   :  { %343 = dma.done.wait [#allocation4], 256  }
 0x315   :  { %344 = vsyncadd [#allocation4], 4294967040 }
 0x316   :  { %250 = vsyncpa [#allocation3], 1 }
 0x317   :  { %251 = vsyncpa [#allocation4], 1 }

</bundles_post_ra>
